<compile_context>
chip_gen: v7x
topology: tpu7x:2x2x1
jax: 0.10.0
libtpu: 0.0.40
codegen_flags: <defaults>
</compile_context>

<pallas_src>
import functools

import jax
import jax.numpy as jnp
from jax.experimental import pallas as pl
from jax.experimental.pallas import tpu as pltpu


# ---------------------------------------------------------------------------
# Tiling helpers
# ---------------------------------------------------------------------------

def _round_up(x, m):
    return (x + m - 1) // m * m


def _pick_divisor(dim, max_tile, quantum):
    """Largest t <= max_tile with t % quantum == 0 and dim % t == 0, else None."""
    t = (max_tile // quantum) * quantum
    while t >= quantum:
        if dim % t == 0:
            return t
        t -= quantum
    return None


def _tile_sublane(dim, max_tile=256):
    """Tile along a sublane-type dim (needs % 8 == 0 or full)."""
    if dim <= max_tile:
        return dim, dim
    t = _pick_divisor(dim, max_tile, 8)
    if t is not None:
        return t, dim
    return max_tile, _round_up(dim, max_tile)


def _tile_lane(dim, max_tile=256):
    """Tile along the lane dim (needs % 128 == 0 or full)."""
    if dim <= max_tile:
        return dim, dim
    t = _pick_divisor(dim, max_tile, 128)
    if t is not None:
        return t, dim
    return 128, _round_up(dim, 128)


def _tile_k(K):
    """Contraction tile: single k-step (no padding) for moderate K."""
    if K <= 2304:
        return K, K
    t = _pick_divisor(K, 2048, 128)
    if t is not None:
        return t, K
    return 2048, _round_up(K, 2048)


# ---------------------------------------------------------------------------
# Pallas kernels
# ---------------------------------------------------------------------------

def _mm_single_kernel(relu, has_res, a_ref, b_ref, bias_ref, *rest):
    """Single-k-step matmul: O = act(A@B + bias [+ residual]). No acc scratch."""
    if has_res:
        res_ref, o_ref = rest
    else:
        (o_ref,) = rest
    y = jnp.dot(a_ref[...], b_ref[...], preferred_element_type=jnp.float32)
    y = y + bias_ref[...]
    if has_res:
        y = y + res_ref[...].astype(jnp.float32)
    if relu:
        y = jnp.maximum(y, 0.0)
    o_ref[...] = y.astype(o_ref.dtype)


def _mm_multi_kernel(relu, has_res, a_ref, b_ref, bias_ref, *rest):
    """Multi-k-step matmul with f32 accumulator scratch."""
    if has_res:
        res_ref, o_ref, acc_ref = rest
    else:
        o_ref, acc_ref = rest
    k = pl.program_id(2)

    @pl.when(k == 0)
    def _():
        acc_ref[...] = jnp.zeros_like(acc_ref)

    acc_ref[...] += jnp.dot(a_ref[...], b_ref[...],
                            preferred_element_type=jnp.float32)

    @pl.when(k == pl.num_programs(2) - 1)
    def _():
        y = acc_ref[...] + bias_ref[...]
        if has_res:
            y = y + res_ref[...].astype(jnp.float32)
        if relu:
            y = jnp.maximum(y, 0.0)
        o_ref[...] = y.astype(o_ref.dtype)


def _conv3x3_kernel(relu, H, W, Cin, x_ref, w_ref, b_ref, mL_ref, mR_ref, o_ref):
    """Direct 3x3 stride-1 pad-1 conv on one image (spatially flattened).

    x_ref : (L, Cin) bf16 -- H-padded image flattened row-major with one extra
            zero row before and after, L = H*W + 2*W + 2.
    w_ref : (9*Cin, tn) bf16 (BN-folded), b_ref: (1, tn) f32.
    mL/mR : (H*W, 1) bf16 masks zeroing the left/right column wrap-around.
    o_ref : (H*W, tn) bf16.
    """
    HW = H * W
    mL = mL_ref[...]
    mR = mR_ref[...]
    acc = None
    for i in range(3):
        for j in range(3):
            s = i * W + j                      # static flat shift for this tap
            a = x_ref[s:s + HW, :]
            if j == 0:
                a = a * mL
            elif j == 2:
                a = a * mR
            t = i * 3 + j
            wt = w_ref[t * Cin:(t + 1) * Cin, :]
            d = jnp.dot(a, wt, preferred_element_type=jnp.float32)
            acc = d if acc is None else acc + d
    y = acc + b_ref[...]
    if relu:
        y = jnp.maximum(y, 0.0)
    o_ref[...] = y.astype(o_ref.dtype)


def _maxpool_kernel(x_ref, o_ref):
    """Max over the stacked-window axis: (9, rows_tile, C) -> (rows_tile, C)."""
    o_ref[...] = jnp.max(x_ref[...], axis=0)


def _avgpool_kernel(x_ref, o_ref):
    """Global average pool over spatial axis: (N, HW, C_tile) -> (N, C_tile)."""
    o_ref[...] = jnp.mean(x_ref[...].astype(jnp.float32), axis=1)


def _head_kernel(x_ref, w1_ref, b1_ref, w2_ref, b2_ref, o_ref):
    """fc1 (+folded BN1d) + ReLU + [Dropout=identity] + fc2, fused."""
    h = jnp.dot(x_ref[...].astype(jnp.bfloat16), w1_ref[...],
                preferred_element_type=jnp.float32)
    h = jnp.maximum(h + b1_ref[...], 0.0)
    # TODO(synk): Dropout(p=0.2) is identity (eval mode); train-mode not implemented.
    y = jnp.dot(h.astype(jnp.bfloat16), w2_ref[...],
                preferred_element_type=jnp.float32) + b2_ref[...]
    o_ref[...] = y.astype(o_ref.dtype)


# ---------------------------------------------------------------------------
# Kernel wrappers
# ---------------------------------------------------------------------------

def matmul_fused(a, b, bias, *, residual=None, relu=False,
                 out_dtype=jnp.bfloat16):
    """A (M,K) @ B (K,N) + bias (N,) [+ residual (M,N)] with fused ReLU."""
    M, K = a.shape
    K2, N = b.shape
    assert K == K2

    tm, Mp = _tile_sublane(M, 256)
    tn, Np = _tile_lane(N, 256)
    tk, Kp = _tile_k(K)

    a = a.astype(jnp.bfloat16)
    b = b.astype(jnp.bfloat16)
    if (Mp, Kp) != (M, K):
        a = jnp.pad(a, ((0, Mp - M), (0, Kp - K)))
    if (Kp, Np) != (K, N):
        b = jnp.pad(b, ((0, Kp - K), (0, Np - N)))
    bias2 = bias.astype(jnp.float32).reshape(1, N)
    if Np != N:
        bias2 = jnp.pad(bias2, ((0, 0), (0, Np - N)))

    has_res = residual is not None
    inputs = [a, b, bias2]
    if has_res:
        r = residual.astype(jnp.bfloat16)
        if (Mp, Np) != (M, N):
            r = jnp.pad(r, ((0, Mp - M), (0, Np - N)))
        inputs.append(r)

    gm, gn, gk = Mp // tm, Np // tn, Kp // tk

    if gk == 1:
        # Single k-step: no accumulator scratch, 2-D grid, weight tile resident
        # across all M-tiles (j outer).
        in_specs = [
            pl.BlockSpec((tm, tk), lambda j, i: (i, 0)),
            pl.BlockSpec((tk, tn), lambda j, i: (0, j)),
            pl.BlockSpec((1, tn), lambda j, i: (0, j)),
        ]
        if has_res:
            in_specs.append(pl.BlockSpec((tm, tn), lambda j, i: (i, j)))
        out_spec = pl.BlockSpec((tm, tn), lambda j, i: (i, j))
        grid = (gn, gm)
        scratch = ()
        kernel = functools.partial(_mm_single_kernel, relu, has_res)
        semantics = ("parallel", "parallel")
    else:
        in_specs = [
            pl.BlockSpec((tm, tk), lambda j, i, k: (i, k)),
            pl.BlockSpec((tk, tn), lambda j, i, k: (k, j)),
            pl.BlockSpec((1, tn), lambda j, i, k: (0, j)),
        ]
        if has_res:
            in_specs.append(pl.BlockSpec((tm, tn), lambda j, i, k: (i, j)))
        out_spec = pl.BlockSpec((tm, tn), lambda j, i, k: (i, j))
        grid = (gn, gm, gk)
        scratch = (pltpu.VMEM((tm, tn), jnp.float32),)
        kernel = functools.partial(_mm_multi_kernel, relu, has_res)
        semantics = ("parallel", "parallel", "arbitrary")

    out = pl.pallas_call(
        kernel,
        out_shape=jax.ShapeDtypeStruct((Mp, Np), out_dtype),
        grid_spec=pltpu.PrefetchScalarGridSpec(
            num_scalar_prefetch=0,
            grid=grid,
            in_specs=in_specs,
            out_specs=out_spec,
            scratch_shapes=scratch,
        ),
        compiler_params=pltpu.CompilerParams(dimension_semantics=semantics),
    )(*inputs)

    if (Mp, Np) != (M, N):
        out = out[:M, :N]
    return out


def conv3x3_s1(x, cp, *, relu=True):
    """Direct Pallas 3x3 stride-1 pad-1 conv (no im2col materialization).

    x: (N, H, W, Cin) bf16.  Returns (N, H, W, Cout) bf16.
    The image is padded along H only, flattened, and bracketed by one zero row;
    every tap (i,j) is then a constant flat shift i*W+j, with left/right column
    wrap-around zeroed by two tiny per-row masks.
    """
    N, H, W, Cin = x.shape
    Cout = cp["w"].shape[1]
    HW = H * W
    L = HW + 2 * W + 2

    xh = jnp.pad(x, ((0, 0), (1, 1), (0, 0), (0, 0)))       # pad H by 1 each side
    xf = xh.reshape(N, (H + 2) * W, Cin)
    xf = jnp.pad(xf, ((0, 0), (1, 1), (0, 0)))               # bracket zero rows

    xpos = jnp.arange(HW, dtype=jnp.int32) % W
    mL = (xpos != 0).astype(jnp.bfloat16).reshape(HW, 1)      # kills x==0   for j=0
    mR = (xpos != W - 1).astype(jnp.bfloat16).reshape(HW, 1)  # kills x==W-1 for j=2

    bias2 = cp["b"].astype(jnp.float32).reshape(1, Cout)
    tn = Cout if Cout <= 256 else 256                         # Cout in {64..512}
    grid = (Cout // tn, N)                                    # weights outer-resident

    kernel = functools.partial(_conv3x3_kernel, relu, H, W, Cin)
    out = pl.pallas_call(
        kernel,
        out_shape=jax.ShapeDtypeStruct((N, HW, Cout), jnp.bfloat16),
        grid_spec=pltpu.PrefetchScalarGridSpec(
            num_scalar_prefetch=0,
            grid=grid,
            in_specs=[
                pl.BlockSpec((None, L, Cin), lambda jc, n: (n, 0, 0)),
                pl.BlockSpec((9 * Cin, tn), lambda jc, n: (0, jc)),
                pl.BlockSpec((1, tn), lambda jc, n: (0, jc)),
                pl.BlockSpec((HW, 1), lambda jc, n: (0, 0)),
                pl.BlockSpec((HW, 1), lambda jc, n: (0, 0)),
            ],
            out_specs=pl.BlockSpec((None, HW, tn), lambda jc, n: (n, 0, jc)),
        ),
        compiler_params=pltpu.CompilerParams(
            dimension_semantics=("parallel", "parallel")),
    )(xf, cp["w"], bias2, mL, mR)

    return out.reshape(N, H, W, Cout)


def conv2d_fused(x, cp, *, stride, pad, relu, residual=None):
    """Dispatch: 1x1 -> reshape+matmul; 3x3 s1 -> direct Pallas conv;
    everything else (stem 7x7, stride-2 3x3) -> im2col + matmul.
    BN is folded into w/b; bias / residual / ReLU run in the kernel epilogue."""
    kh, kw = cp["kh"], cp["kw"]
    N, H, W, Cin = x.shape
    cout = cp["w"].shape[1]

    if kh == 1 and kw == 1:
        if stride > 1:
            x = x[:, ::stride, ::stride, :]
        _, oh, ow, _ = x.shape
        a = x.reshape(N * oh * ow, Cin)
    elif kh == 3 and kw == 3 and stride == 1 and pad == 1 and residual is None:
        return conv3x3_s1(x, cp, relu=relu)
    else:
        # TODO(synk): stride-2 convs (stem + 3 downsample 3x3s) still use JAX-side
        # im2col (only ~2.25x blow-up thanks to the stride-2 decimation).
        xp = jnp.pad(x, ((0, 0), (pad, pad), (pad, pad), (0, 0)))
        Hp, Wp = H + 2 * pad, W + 2 * pad
        oh = (Hp - kh) // stride + 1
        ow = (Wp - kw) // stride + 1
        cols = []
        for i in range(kh):
            for j in range(kw):
                cols.append(xp[:, i:i + stride * (oh - 1) + 1:stride,
                               j:j + stride * (ow - 1) + 1:stride, :])
        patches = jnp.stack(cols, axis=3)             # (N, oh, ow, kh*kw, Cin)
        a = patches.reshape(N * oh * ow, kh * kw * Cin)

    res2d = None
    if residual is not None:
        res2d = residual.reshape(N * oh * ow, residual.shape[-1])

    y = matmul_fused(a, cp["w"], cp["b"], residual=res2d, relu=relu,
                     out_dtype=jnp.bfloat16)
    return y.reshape(N, oh, ow, cout)


def maxpool_3x3_s2_p1(x):
    # TODO(synk): still materializes the 9-slice stack in HBM; a direct halo'd
    # Pallas kernel would cut its traffic ~2x (small fraction of total).
    N, H, W, C = x.shape
    xp = jnp.pad(x, ((0, 0), (1, 1), (1, 1), (0, 0)),
                 constant_values=-jnp.inf)
    oh = (H + 2 - 3) // 2 + 1
    ow = (W + 2 - 3) // 2 + 1
    slices = []
    for i in range(3):
        for j in range(3):
            slices.append(xp[:, i:i + 2 * (oh - 1) + 1:2,
                             j:j + 2 * (ow - 1) + 1:2, :])
    rows = N * oh * ow
    stacked = jnp.stack(slices, axis=0).reshape(9, rows, C)

    tr, rows_p = _tile_sublane(rows, 512)
    if rows_p != rows:
        stacked = jnp.pad(stacked, ((0, 0), (0, rows_p - rows), (0, 0)),
                          constant_values=-jnp.inf)

    out = pl.pallas_call(
        _maxpool_kernel,
        out_shape=jax.ShapeDtypeStruct((rows_p, C), x.dtype),
        grid_spec=pltpu.PrefetchScalarGridSpec(
            num_scalar_prefetch=0,
            grid=(rows_p // tr,),
            in_specs=[pl.BlockSpec((9, tr, C), lambda i: (0, i, 0))],
            out_specs=pl.BlockSpec((tr, C), lambda i: (i, 0)),
        ),
        compiler_params=pltpu.CompilerParams(
            dimension_semantics=("parallel",)),
    )(stacked)
    if rows_p != rows:
        out = out[:rows]
    return out.reshape(N, oh, ow, C)


def global_avgpool(x):
    N, H, W, C = x.shape
    x3 = x.reshape(N, H * W, C)
    tc = 256 if C % 256 == 0 else C           # C = 2048 -> 256-wide channel blocks
    return pl.pallas_call(
        _avgpool_kernel,
        out_shape=jax.ShapeDtypeStruct((N, C), jnp.float32),
        grid_spec=pltpu.PrefetchScalarGridSpec(
            num_scalar_prefetch=0,
            grid=(C // tc,),
            in_specs=[pl.BlockSpec((N, H * W, tc), lambda j: (0, 0, j))],
            out_specs=pl.BlockSpec((N, tc), lambda j: (0, j)),
        ),
        compiler_params=pltpu.CompilerParams(
            dimension_semantics=("parallel",)),
    )(x3)


def head_fused(feat, fc1, fc2):
    """fc1 (+folded BN1d) + ReLU + Dropout(identity) + fc2, one Pallas call."""
    N = feat.shape[0]
    return pl.pallas_call(
        _head_kernel,
        out_shape=jax.ShapeDtypeStruct((N, fc2["w"].shape[1]), jnp.float32),
    )(feat, fc1["w"], fc1["b"].reshape(1, -1),
      fc2["w"], fc2["b"].reshape(1, -1))


# ---------------------------------------------------------------------------
# Parameter construction (deterministic init, BN folded; no checkpoint IO)
# ---------------------------------------------------------------------------

_EPS = 1e-5


def _conv_w(key, kh, kw, cin, cout):
    fan_in = kh * kw * cin
    return jax.random.normal(key, (kh, kw, cin, cout),
                             jnp.float32) * jnp.sqrt(2.0 / fan_in)


def _fold_conv_bn(key, kh, kw, cin, cout):
    """Conv (no bias) followed by inference BN, folded:
       W' = W * g/sqrt(v+eps),  b' = beta - mean * g/sqrt(v+eps)."""
    w = _conv_w(key, kh, kw, cin, cout)
    gamma = jnp.ones((cout,), jnp.float32)
    beta = jnp.zeros((cout,), jnp.float32)
    mean = jnp.zeros((cout,), jnp.float32)
    var = jnp.ones((cout,), jnp.float32)
    scale = gamma * jax.lax.rsqrt(var + _EPS)
    w2d = (w * scale).reshape(kh * kw * cin, cout).astype(jnp.bfloat16)
    bias = (beta - mean * scale).astype(jnp.float32)
    return dict(w=w2d, b=bias, kh=kh, kw=kw)


def init_params(key):
    # TODO(synk): the original module loads pretrained ResNet50 weights from
    # disk; no file IO here, so deterministic random init stands in.
    keys = iter(jax.random.split(key, 128))
    p = {}
    p["stem"] = _fold_conv_bn(next(keys), 7, 7, 3, 64)

    layer_cfg = [(3, 64, 1), (4, 128, 2), (6, 256, 2), (3, 512, 2)]
    in_c = 64
    layers = []
    for nblocks, width, stride in layer_cfg:
        blocks = []
        for b in range(nblocks):
            s = stride if b == 0 else 1
            has_ds = (b == 0)
            blk = dict(
                c1=_fold_conv_bn(next(keys), 1, 1, in_c, width),
                c2=_fold_conv_bn(next(keys), 3, 3, width, width),
                c3=_fold_conv_bn(next(keys), 1, 1, width, width * 4),
            )
            if has_ds:
                blk["ds"] = _fold_conv_bn(next(keys), 1, 1, in_c, width * 4)
            blocks.append((blk, s, has_ds))
            in_c = width * 4
        layers.append(blocks)
    p["layers"] = layers

    # Head: fc1(2048->256) with BatchNorm1d(256) folded (eval stats), fc2(256->74).
    w1 = jax.random.normal(next(keys), (2048, 256), jnp.float32) * 0.02
    b1 = jnp.zeros((256,), jnp.float32)
    gamma = jnp.ones((256,), jnp.float32)
    beta = jnp.zeros((256,), jnp.float32)
    mean = jnp.zeros((256,), jnp.float32)
    var = jnp.ones((256,), jnp.float32)
    s1 = gamma * jax.lax.rsqrt(var + _EPS)
    p["fc1"] = dict(w=(w1 * s1).astype(jnp.bfloat16),
                    b=((b1 - mean) * s1 + beta).astype(jnp.float32))

    w2 = jax.random.normal(next(keys), (256, 74), jnp.float32) * 0.02
    p["fc2"] = dict(w=w2.astype(jnp.bfloat16),
                    b=jnp.zeros((74,), jnp.float32))
    return p


# ---------------------------------------------------------------------------
# Forward pass (matches ResN50_10.forward, inference mode)
# ---------------------------------------------------------------------------

def resn50_10_forward(params, x_nchw):
    # NCHW (PyTorch) -> NHWC, bf16 activations throughout the backbone.
    x = jnp.transpose(x_nchw, (0, 2, 3, 1)).astype(jnp.bfloat16)

    # Stem: conv7x7 s2 (BN+ReLU fused into the matmul epilogue) + maxpool.
    x = conv2d_fused(x, params["stem"], stride=2, pad=3, relu=True)
    x = maxpool_3x3_s2_p1(x)

    # Bottleneck layers; residual add + ReLU fused into conv3's matmul epilogue,
    # 3x3 stride-1 convs run through the direct (im2col-free) Pallas conv kernel.
    for blocks in params["layers"]:
        for blk, s, has_ds in blocks:
            identity = x
            if has_ds:
                identity = conv2d_fused(x, blk["ds"], stride=s, pad=0,
                                        relu=False)
            h = conv2d_fused(x, blk["c1"], stride=1, pad=0, relu=True)
            h = conv2d_fused(h, blk["c2"], stride=s, pad=1, relu=True)
            x = conv2d_fused(h, blk["c3"], stride=1, pad=0, relu=True,
                             residual=identity)

    # Global average pool -> 2048-d feature (base_model.fc is Identity).
    feat = global_avgpool(x)                                    # (N, 2048) f32

    # Head: fc1 (+BN1d folded) -> ReLU -> Dropout(identity, eval) -> fc2.
    # TODO(synk): lane-dense (128-wide) store packing for the Cout=64 conv
    # outputs was intentionally not applied (in-kernel reshape lowering risk).
    return head_fused(feat, params["fc1"], params["fc2"])      # (N, 74) f32


# ---------------------------------------------------------------------------
# Main
# ---------------------------------------------------------------------------

if __name__ == "__main__":
    key = jax.random.PRNGKey(0)
    k_params, k_x = jax.random.split(key)

    params = init_params(k_params)
    # Small deterministic input (module nominally expects [3,224,224]; 64x64
    # keeps every downsampling stage valid while staying tiny/fast).
    x = jax.random.normal(k_x, (2, 3, 64, 64), jnp.float32)

    out = resn50_10_forward(params, x)
    out = jax.block_until_ready(out)
    assert out.shape == (2, 74), out.shape
    assert jnp.all(jnp.isfinite(out))
    print("KERNEL_OK")
</pallas_src>

<mosaic_0001>
module attributes {stable_mosaic.version = 11 : i64} {
  func.func @_mm_single_kernel(%arg0: i32, %arg1: i32, %arg2: memref<256x147xbf16, #tpu.memory_space<vmem>>, %arg3: memref<147x64xbf16, #tpu.memory_space<vmem>>, %arg4: memref<1x64xf32, #tpu.memory_space<vmem>>, %arg5: memref<256x64xbf16, #tpu.memory_space<vmem>>) attributes {dimension_semantics = [#tpu.dimension_semantics<parallel>, #tpu.dimension_semantics<parallel>], iteration_bounds = array<i64: 1, 8>, scalar_prefetch = 0 : i64, scratch_operands = 0 : i64, tpu.core_type = #tpu.core_type<tc>, window_params = [{transform_indices = @transform_0, window_bounds = array<i64: 256, 147>}, {transform_indices = @transform_1, window_bounds = array<i64: 147, 64>}, {transform_indices = @transform_2, window_bounds = array<i64: 1, 64>}, {transform_indices = @transform_3, window_bounds = array<i64: 256, 64>}]} {
    %c0 = arith.constant 0 : index
    %c0_0 = arith.constant 0 : index
    %0 = vector.load %arg2[%c0, %c0_0] : memref<256x147xbf16, #tpu.memory_space<vmem>>, vector<256x147xbf16>
    %c0_1 = arith.constant 0 : index
    %c0_2 = arith.constant 0 : index
    %1 = vector.load %arg3[%c0_1, %c0_2] : memref<147x64xbf16, #tpu.memory_space<vmem>>, vector<147x64xbf16>
    %cst = arith.constant dense<0.000000e+00> : vector<256x64xf32>
    %2 = tpu.matmul %0, %1, %cst {dimension_numbers = #tpu.dot_dimension_numbers<[1], [0], [0], [1], [0, 0, 1, 1], [], []>} : vector<256x147xbf16>, vector<147x64xbf16>, vector<256x64xf32> -> vector<256x64xf32>
    %c0_3 = arith.constant 0 : index
    %c0_4 = arith.constant 0 : index
    %3 = vector.load %arg4[%c0_3, %c0_4] : memref<1x64xf32, #tpu.memory_space<vmem>>, vector<1x64xf32>
    %4 = vector.broadcast %3 : vector<1x64xf32> to vector<256x64xf32>
    %5 = arith.addf %2, %4 : vector<256x64xf32>
    %cst_5 = arith.constant 0.000000e+00 : f32
    %6 = vector.broadcast %cst_5 : f32 to vector<256x64xf32>
    %7 = arith.maximumf %5, %6 : vector<256x64xf32>
    %8 = arith.truncf %7 : vector<256x64xf32> to vector<256x64xbf16>
    %c0_6 = arith.constant 0 : index
    %c0_7 = arith.constant 0 : index
    %9 = vector.load %arg5[%c0_6, %c0_7] : memref<256x64xbf16, #tpu.memory_space<vmem>>, vector<256x64xbf16>
    tpu.vector_store %arg5[%c0_6, %c0_7], %8 {strides = array<i32>} : memref<256x64xbf16, #tpu.memory_space<vmem>>, vector<256x64xbf16>,
    return
  }
  func.func @transform_0(%arg0: i32, %arg1: i32) -> (i32, i32) {
    %c0_i32 = arith.constant 0 : i32
    %c0_i32_0 = arith.constant 0 : i32
    return %arg1, %c0_i32 : i32, i32
  }
  func.func @transform_1(%arg0: i32, %arg1: i32) -> (i32, i32) {
    %c0_i32 = arith.constant 0 : i32
    %c0_i32_0 = arith.constant 0 : i32
    return %c0_i32, %arg0 : i32, i32
  }
  func.func @transform_2(%arg0: i32, %arg1: i32) -> (i32, i32) {
    %c0_i32 = arith.constant 0 : i32
    %c0_i32_0 = arith.constant 0 : i32
    return %c0_i32, %arg0 : i32, i32
  }
  func.func @transform_3(%arg0: i32, %arg1: i32) -> (i32, i32) {
    %c0_i32 = arith.constant 0 : i32
    return %arg1, %arg0 : i32, i32
  }
}

</mosaic_0001>

<bundles_post_ra>
// kernel: tpu_custom_call.1
= control target key start
LH: loop header
LB: loop body
LE: loop exit
PB: predicated region body
PF: predicated region fallthrough
CT: control target
= control target key end

     0   :  { %s1288_s12 = smov 0   ;;  %s1290_s13 = smov 0   ;;  %s1508_s0 = inlined_call_operand.vmem [shape: bf16[2048,147], index: 0, kind: input, shape index: {}]   ;;  %s1509_s1 = inlined_call_operand.vmem [shape: bf16[147,64], index: 1, kind: input, shape index: {}]   ;;  %s1510_s2 = inlined_call_operand.vmem [shape: f32[1,64], index: 2, kind: input, shape index: {}]   ;;  %s1511_s3 = inlined_call_operand.vmem [shape: bf16[2048,64], index: 3, kind: output, shape index: {}]  }
   0x1   :  { %s1292_s14 = smov 0  }
   0x2 LB: > { %s22_s15 = sadd.s32 1, %s1260_s13  ;;  %p1006_p0 = scmp.ge.s32.totalorder %s1264_s14, 1  ;;  %s1264_s14 = sphi %s1292_s14, %s13_s14   ;;  %s1260_s13 = sphi %s1290_s13, %s1513_s13   ;;  %s1256_s12 = sphi %s1288_s12, %s1512_s12  }
   0x3   : > { %p23_p1 = scmp.ge.s32.totalorder %s22_s15, 8  ;;  %p170_p2 = scmp.lt.s32.totalorder %s1264_s14, 9 }
   0x5   : > { %s1515_s15 = smov (%p23_p1, %s22_s15), 0  ;;  %p171_p3 = pnand %p1006_p0, %p170_p2 }
   0x6   : > { %v1184_v0 = vld [vmem:[%s1509_s1] sm:$0xff] (!%p171_p3)   ;;  %v1266_v1 = vmov (!%p171_p3), 0   ;;  %v1185_v2 = vld [vmem:[%s1509_s1 + $0x8] sm:$0xff] (!%p171_p3)   ;;  %v1186_v3 = vld [vmem:[%s1509_s1 + $0x10] sm:$0xff] (!%p171_p3)   ;;  %s1007_s22 = sshll.u32 (!%p171_p3), %s1256_s12, 5  ;;  %vm488_vm0 = vcmask (!%p171_p3), 154624  }
   0x7   : > { %174 = sbr.rel (%p171_p3) target bundleno = 324 (0x144), region = 32  ;;  %544 = vmatprep.subr.bf16.mxu0 (!%p171_p3), %v1266_v1  ;;  %1138 = vmatprep.subr.bf16.mxu1 (!%p171_p3), %v1266_v1  ;;  %p206_p4 = scmp.lt.s32.totalorder (!%p171_p3), %s1007_s22, 255  ;;  %v1187_v4 = vld [vmem:[%s1509_s1 + $0x18] sm:$0xff] (!%p171_p3)   ;;  %v1188_v5 = vld [vmem:[%s1509_s1 + $0x20] sm:$0xff] (!%p171_p3)   ;;  %v1189_v8 = vld [vmem:[%s1509_s1 + $0x28] sm:$0xff] (!%p171_p3)   ;;  %vm537_vm1 = vcmask (!%p171_p3), 1040384  }
   0x8   : > { %545 = vmatpush1.bf16.msra.mxu0 (!%p171_p3), %v1184_v0  ;;  %1148 = vmatpush1.bf16.msra.mxu1 (!%p171_p3), %v1184_v0  ;;  %v1190_v9 = vld [vmem:[%s1509_s1 + $0x30] sm:$0xff] (!%p171_p3)   ;;  %v1191_v10 = vld [vmem:[%s1509_s1 + $0x38] sm:$0xff] (!%p171_p3)   ;;  %vm538_vm2 = vcmask (!%p171_p3), 1041408   ;;  %v1267_v11 = vmov (!%p171_p3), 65535   ;;  %v1192_v13 = vld [vmem:[%s1509_s1 + $0x40] sm:$0xff] (!%p171_p3)   ;;  %vm865_vm3 = vcmask (!%p171_p3), 519168  }
   0x9   : > { %546 = vmatprep.subr.bf16.mxu0 (!%p171_p3), %v1266_v1  ;;  %1139 = vmatprep.subr.bf16.mxu1 (!%p171_p3), %v1266_v1  ;;  %v539_v12 = vsel (!%p171_p3), %vm537_vm1, 4294967295, %v1267_v11  ;;  %v1193_v14 = vld [vmem:[%s1509_s1 + $0x48] ss:$0 sps:$4 sm:$0x33] (!%p171_p3)   ;;  %v1395_v47 = vld [vmem:[%s1510_s2] ss:$0 sm:$0xff] (!%p171_p3) }
   0xa   : > { %v540_v15 = vsel (!%p171_p3), %vm538_vm2, %v539_v12, 0 }
   0xb   : > { %v542_v16 = vand.u32 (!%p171_p3), %v1193_v14, %v540_v15 }
   0xc   : > { %547 = vmatpush1.bf16.msra.mxu0 (!%p171_p3), %v1185_v2  ;;  %1149 = vmatpush1.bf16.msra.mxu1 (!%p171_p3), %v1185_v2 }
   0xd   : > { %548 = vmatprep.subr.bf16.mxu0 (!%p171_p3), %v1266_v1  ;;  %1140 = vmatprep.subr.bf16.mxu1 (!%p171_p3), %v1266_v1 }
   0xe   : > { %s1517_s22 = smov (!%p206_p4, %s1007_s22), 255 }
   0xf   : > { %s1105_s25 = sshll.u32 %s1517_s22, 3  ;;  %s1011_s19 = sshll.u32 %s1517_s22, 2 }
  0x10   : > { %549 = vmatpush1.bf16.msra.mxu0 %v1186_v3  ;;  %1150 = vmatpush1.bf16.msra.mxu1 %v1186_v3  ;;  %s1324_s28 = scalar_lea.vmem %s1508_s0, %s1105_s25  ;;  %s1405_s22 = scalar_lea.vmem %s1511_s3, %s1011_s19 }
  0x11   : > { %550 = vmatprep.subr.bf16.mxu0 %v1266_v1  ;;  %1141 = vmatprep.subr.bf16.mxu1 %v1266_v1  ;;  %v1196_v6 = vld [vmem:[%s1324_s28 + $0x4] ss:$8 sps:$4 sm:$0xff]   ;;  %v1194_v17 = vld [vmem:[%s1324_s28] ss:$8 sps:$4 sm:$0xff]   ;;  %v1200_v19 = vld [vmem:[%s1324_s28 + $0x14] ss:$8 sps:$4 sm:$0xff]  }
  0x12   : > { %v1199_v7 = vld [vmem:[%s1324_s28 + $0x84] ss:$8 sps:$4 sm:$0xff]   ;;  %1055 = vmatprep.mubr.msk.bf16.mxu0 %vm488_vm0, %v1196_v6  ;;  %v1197_v18 = vld [vmem:[%s1324_s28 + $0x80] ss:$8 sps:$4 sm:$0xff]   ;;  %v1202_v20 = vld [vmem:[%s1324_s28 + $0x94] ss:$8 sps:$4 sm:$0xff]  }
  0x13   : > { %1063 = vmatprep.mubr.msk.bf16.mxu1 %vm488_vm0, %v1199_v7  ;;  %v1204_v21 = vld [vmem:[%s1324_s28 + $0x10] ss:$8 sps:$4 sm:$0xff]   ;;  %v1206_v23 = vld [vmem:[%s1324_s28 + $0x24] ss:$8 sps:$4 sm:$0xff]   ;;  %v1210_v25 = vld [vmem:[%s1324_s28 + $0x20] ss:$8 sps:$4 sm:$0xff]  }
  0x14   : > { %551 = vmatpush1.bf16.msra.mxu0 %v1187_v4  ;;  %1151 = vmatpush1.bf16.msra.mxu1 %v1187_v4  ;;  %v1205_v22 = vld [vmem:[%s1324_s28 + $0x90] ss:$8 sps:$4 sm:$0xff]   ;;  %v1208_v24 = vld [vmem:[%s1324_s28 + $0xa4] ss:$8 sps:$4 sm:$0xff]   ;;  %v1211_v26 = vld [vmem:[%s1324_s28 + $0xa0] ss:$8 sps:$4 sm:$0xff]  }
  0x15   : > { %552 = vmatprep.subr.bf16.mxu0 %v1266_v1  ;;  %1142 = vmatprep.subr.bf16.mxu1 %v1266_v1  ;;  %v1212_v27 = vld [vmem:[%s1324_s28 + $0x34] ss:$8 sps:$4 sm:$0xff]   ;;  %v1216_v29 = vld [vmem:[%s1324_s28 + $0x30] ss:$8 sps:$4 sm:$0xff]   ;;  %v1218_v31 = vld [vmem:[%s1324_s28 + $0x44] ss:$8 sps:$4 sm:$0xff]  }
  0x16   : > { %v1214_v28 = vld [vmem:[%s1324_s28 + $0xb4] ss:$8 sps:$4 sm:$0xff]   ;;  %v1217_v30 = vld [vmem:[%s1324_s28 + $0xb0] ss:$8 sps:$4 sm:$0xff]   ;;  %v1220_v32 = vld [vmem:[%s1324_s28 + $0xc4] ss:$8 sps:$4 sm:$0xff]  }
  0x17   : > { %v1222_v33 = vld [vmem:[%s1324_s28 + $0x40] ss:$8 sps:$4 sm:$0xff]   ;;  %v1224_v35 = vld [vmem:[%s1324_s28 + $0x54] ss:$8 sps:$4 sm:$0xff]   ;;  %v1228_v37 = vld [vmem:[%s1324_s28 + $0x50] ss:$8 sps:$4 sm:$0xff]  }
  0x18   : > { %553 = vmatpush1.bf16.msra.mxu0 %v1188_v5  ;;  %1152 = vmatpush1.bf16.msra.mxu1 %v1188_v5  ;;  %v1223_v34 = vld [vmem:[%s1324_s28 + $0xc0] ss:$8 sps:$4 sm:$0xff]   ;;  %v1226_v36 = vld [vmem:[%s1324_s28 + $0xd4] ss:$8 sps:$4 sm:$0xff]   ;;  %v1229_v38 = vld [vmem:[%s1324_s28 + $0xd0] ss:$8 sps:$4 sm:$0xff]  }
  0x19   : > { %554 = vmatprep.subr.bf16.mxu0 %v1266_v1  ;;  %1143 = vmatprep.subr.bf16.mxu1 %v1266_v1  ;;  %v1230_v39 = vld [vmem:[%s1324_s28 + $0x64] ss:$8 sps:$4 sm:$0xff]   ;;  %v1234_v41 = vld [vmem:[%s1324_s28 + $0x60] ss:$8 sps:$4 sm:$0xff]   ;;  %v1236_v43 = vld [vmem:[%s1324_s28 + $0x74] ss:$8 sps:$4 sm:$0xff]  }
  0x1a   : > { %v1232_v40 = vld [vmem:[%s1324_s28 + $0xe4] ss:$8 sps:$4 sm:$0xff]   ;;  %v1235_v42 = vld [vmem:[%s1324_s28 + $0xe0] ss:$8 sps:$4 sm:$0xff]   ;;  %v1238_v44 = vld [vmem:[%s1324_s28 + $0xf4] ss:$8 sps:$4 sm:$0xff]  }
  0x1b   : > { %v1240_v45 = vld [vmem:[%s1324_s28 + $0x70] ss:$8 sps:$4 sm:$0xff]  }
  0x1c   : > { %555 = vmatpush1.bf16.msra.mxu0 %v1189_v8  ;;  %1153 = vmatpush1.bf16.msra.mxu1 %v1189_v8  ;;  %v1241_v46 = vld [vmem:[%s1324_s28 + $0xf0] ss:$8 sps:$4 sm:$0xff]  }
  0x1d   : > { %556 = vmatprep.subr.bf16.mxu0 %v1266_v1  ;;  %1144 = vmatprep.subr.bf16.mxu1 %v1266_v1 }
  0x20   : > { %557 = vmatpush1.bf16.msra.mxu0 %v1190_v9  ;;  %1154 = vmatpush1.bf16.msra.mxu1 %v1190_v9 }
  0x21   : > { %558 = vmatprep.subr.bf16.mxu0 %v1266_v1  ;;  %1145 = vmatprep.subr.bf16.mxu1 %v1266_v1 }
  0x24   : > { %559 = vmatpush1.bf16.msra.mxu0 %v1191_v10  ;;  %1155 = vmatpush1.bf16.msra.mxu1 %v1191_v10 }
  0x25   : > { %560 = vmatprep.subr.bf16.mxu0 %v1266_v1  ;;  %1146 = vmatprep.subr.bf16.mxu1 %v1266_v1 }
  0x28   : > { %561 = vmatpush1.bf16.msra.mxu0 %v1192_v13  ;;  %1156 = vmatpush1.bf16.msra.mxu1 %v1192_v13 }
  0x29   : > { %562 = vmatprep.subr.bf16.mxu0 %v1266_v1  ;;  %1147 = vmatprep.subr.bf16.mxu1 %v1266_v1 }
  0x2c   : > { %563 = vmatpush1.bf16.msra.mxu0 %v542_v16  ;;  %1157 = vmatpush1.bf16.msra.mxu1 %v542_v16 }
  0x2f   : > { %577 = vmatmul.mubr.bf16.vlgmr.msra.gmra.mrb[0].mxu0 %v1194_v17  ;;  %641 = vmatmul.mubr.bf16.vlgmr.msra.gmra.mrb[0].mxu1 %v1197_v18 }
  0x30   : > { %1056 = vmatprep.mubr.msk.bf16.mxu0 %vm488_vm0, %v1200_v19  ;;  %1064 = vmatprep.mubr.msk.bf16.mxu1 %vm488_vm0, %v1202_v20 }
  0x37   : > { %585 = vmatmul.mubr.bf16.gmra.mrb[4].mxu0 %v1204_v21  ;;  %649 = vmatmul.mubr.bf16.gmra.mrb[4].mxu1 %v1205_v22 }
  0x38   : > { %1057 = vmatprep.mubr.msk.bf16.mxu0 %vm488_vm0, %v1206_v23  ;;  %1065 = vmatprep.mubr.msk.bf16.mxu1 %vm488_vm0, %v1208_v24 }
  0x3f   : > { %593 = vmatmul.mubr.bf16.gmra.mrb[8].mxu0 %v1210_v25  ;;  %657 = vmatmul.mubr.bf16.gmra.mrb[8].mxu1 %v1211_v26 }
  0x40   : > { %1058 = vmatprep.mubr.msk.bf16.mxu0 %vm488_vm0, %v1212_v27  ;;  %1066 = vmatprep.mubr.msk.bf16.mxu1 %vm488_vm0, %v1214_v28 }
  0x47   : > { %601 = vmatmul.mubr.bf16.gmra.mrb[12].mxu0 %v1216_v29  ;;  %665 = vmatmul.mubr.bf16.gmra.mrb[12].mxu1 %v1217_v30 }
  0x48   : > { %1059 = vmatprep.mubr.msk.bf16.mxu0 %vm488_vm0, %v1218_v31  ;;  %1067 = vmatprep.mubr.msk.bf16.mxu1 %vm488_vm0, %v1220_v32 }
  0x4f   : > { %609 = vmatmul.mubr.bf16.gmra.mrb[16].mxu0 %v1222_v33  ;;  %673 = vmatmul.mubr.bf16.gmra.mrb[16].mxu1 %v1223_v34 }
  0x50   : > { %1060 = vmatprep.mubr.msk.bf16.mxu0 %vm488_vm0, %v1224_v35  ;;  %1068 = vmatprep.mubr.msk.bf16.mxu1 %vm488_vm0, %v1226_v36 }
  0x57   : > { %617 = vmatmul.mubr.bf16.gmra.mrb[20].mxu0 %v1228_v37  ;;  %681 = vmatmul.mubr.bf16.gmra.mrb[20].mxu1 %v1229_v38 }
  0x58   : > { %1061 = vmatprep.mubr.msk.bf16.mxu0 %vm488_vm0, %v1230_v39  ;;  %1069 = vmatprep.mubr.msk.bf16.mxu1 %vm488_vm0, %v1232_v40 }
  0x5f   : > { %625 = vmatmul.mubr.bf16.gmra.mrb[24].mxu0 %v1234_v41  ;;  %689 = vmatmul.mubr.bf16.gmra.mrb[24].mxu1 %v1235_v42 }
  0x60   : > { %1062 = vmatprep.mubr.msk.bf16.mxu0 %vm488_vm0, %v1236_v43  ;;  %1070 = vmatprep.mubr.msk.bf16.mxu1 %vm488_vm0, %v1238_v44 }
  0x67   : > { %633 = vmatmul.mubr.bf16.gmra.mrb[28].mxu0 %v1240_v45  ;;  %697 = vmatmul.mubr.bf16.gmra.mrb[28].mxu1 %v1241_v46 }
 0x102   : > { %v578_v48 = vpop.f32.mrb[0].mxu0  ;;  %v642_v49 = vpop.f32.mrb[0].mxu1 }
 0x103   : > { %v579_v50 = vadd.f32 %v1395_v47, %v578_v48  ;;  %v643_v51 = vadd.f32 %v1395_v47, %v642_v49  ;;  %v580_v52 = vpop.f32.mrb[1].mxu0  ;;  %v644_v53 = vpop.f32.mrb[1].mxu1 }
 0x104   : > { %v581_v54 = vpop.f32.mrb[2].mxu0  ;;  %v645_v55 = vpop.f32.mrb[2].mxu1 }
 0x105   : > { %v705_v56 = vmax.f32 %v579_v50, 0.0  ;;  %v721_v57 = vmax.f32 %v643_v51, 0.0  ;;  %v582_v58 = vadd.f32 %v1395_v47, %v581_v54  ;;  %v646_v59 = vadd.f32 %v1395_v47, %v645_v55  ;;  %v583_v60 = vpop.f32.mrb[3].mxu0  ;;  %v647_v61 = vpop.f32.mrb[3].mxu1 }
 0x107   : > { %v1106_v62 = vpack.c.bf16 %v705_v56, %v705_v56  ;;  %v1122_v63 = vpack.c.bf16 %v721_v57, %v721_v57  ;;  %v706_v0 = vmax.f32 %v582_v58, 0.0  ;;  %v722_v1 = vmax.f32 %v646_v59, 0.0 }
 0x109   : > { %866 = vst.msk [vmem:[%s1405_s22] sm:$0xf] %vm865_vm3, %v1106_v62  ;;  %882 = vst.msk [vmem:[%s1405_s22 + $0x40] sm:$0xf] %vm865_vm3, %v1122_v63  ;;  %v1107_v2 = vpack.c.bf16 %v706_v0, %v706_v0  ;;  %v1123_v3 = vpack.c.bf16 %v722_v1, %v722_v1 }
 0x10a   : > { %v586_v4 = vpop.f32.mrb[4].mxu0  ;;  %v650_v5 = vpop.f32.mrb[4].mxu1 }
 0x10b   : > { %867 = vst.msk [vmem:[%s1405_s22 + $0x4] sm:$0xf] %vm865_vm3, %v1107_v2  ;;  %883 = vst.msk [vmem:[%s1405_s22 + $0x44] sm:$0xf] %vm865_vm3, %v1123_v3  ;;  %v587_v6 = vadd.f32 %v1395_v47, %v586_v4  ;;  %v651_v7 = vadd.f32 %v1395_v47, %v650_v5  ;;  %v588_v8 = vpop.f32.mrb[5].mxu0  ;;  %v652_v9 = vpop.f32.mrb[5].mxu1 }
 0x10c   : > { %v589_v10 = vpop.f32.mrb[6].mxu0  ;;  %v653_v11 = vpop.f32.mrb[6].mxu1 }
 0x10d   : > { %v707_v12 = vmax.f32 %v587_v6, 0.0  ;;  %v723_v13 = vmax.f32 %v651_v7, 0.0  ;;  %v590_v14 = vadd.f32 %v1395_v47, %v589_v10  ;;  %v654_v15 = vadd.f32 %v1395_v47, %v653_v11  ;;  %v591_v16 = vpop.f32.mrb[7].mxu0  ;;  %v655_v17 = vpop.f32.mrb[7].mxu1 }
 0x10f   : > { %v1108_v18 = vpack.c.bf16 %v707_v12, %v707_v12  ;;  %v1124_v19 = vpack.c.bf16 %v723_v13, %v723_v13  ;;  %v708_v20 = vmax.f32 %v590_v14, 0.0  ;;  %v724_v21 = vmax.f32 %v654_v15, 0.0 }
 0x111   : > { %868 = vst.msk [vmem:[%s1405_s22 + $0x8] sm:$0xf] %vm865_vm3, %v1108_v18  ;;  %884 = vst.msk [vmem:[%s1405_s22 + $0x48] sm:$0xf] %vm865_vm3, %v1124_v19  ;;  %v1109_v22 = vpack.c.bf16 %v708_v20, %v708_v20  ;;  %v1125_v23 = vpack.c.bf16 %v724_v21, %v724_v21 }
 0x112   : > { %v594_v24 = vpop.f32.mrb[8].mxu0  ;;  %v658_v25 = vpop.f32.mrb[8].mxu1 }
 0x113   : > { %869 = vst.msk [vmem:[%s1405_s22 + $0xc] sm:$0xf] %vm865_vm3, %v1109_v22  ;;  %885 = vst.msk [vmem:[%s1405_s22 + $0x4c] sm:$0xf] %vm865_vm3, %v1125_v23  ;;  %v595_v26 = vadd.f32 %v1395_v47, %v594_v24  ;;  %v659_v27 = vadd.f32 %v1395_v47, %v658_v25  ;;  %v596_v28 = vpop.f32.mrb[9].mxu0  ;;  %v660_v29 = vpop.f32.mrb[9].mxu1 }
 0x114   : > { %v597_v30 = vpop.f32.mrb[10].mxu0  ;;  %v661_v31 = vpop.f32.mrb[10].mxu1 }
 0x115   : > { %v709_v32 = vmax.f32 %v595_v26, 0.0  ;;  %v725_v33 = vmax.f32 %v659_v27, 0.0  ;;  %v598_v34 = vadd.f32 %v1395_v47, %v597_v30  ;;  %v662_v35 = vadd.f32 %v1395_v47, %v661_v31  ;;  %v599_v36 = vpop.f32.mrb[11].mxu0  ;;  %v663_v37 = vpop.f32.mrb[11].mxu1 }
 0x117   : > { %v1110_v38 = vpack.c.bf16 %v709_v32, %v709_v32  ;;  %v1126_v39 = vpack.c.bf16 %v725_v33, %v725_v33  ;;  %v710_v40 = vmax.f32 %v598_v34, 0.0  ;;  %v726_v41 = vmax.f32 %v662_v35, 0.0 }
 0x119   : > { %870 = vst.msk [vmem:[%s1405_s22 + $0x10] sm:$0xf] %vm865_vm3, %v1110_v38  ;;  %886 = vst.msk [vmem:[%s1405_s22 + $0x50] sm:$0xf] %vm865_vm3, %v1126_v39  ;;  %v1111_v42 = vpack.c.bf16 %v710_v40, %v710_v40  ;;  %v1127_v43 = vpack.c.bf16 %v726_v41, %v726_v41 }
 0x11a   : > { %v602_v44 = vpop.f32.mrb[12].mxu0  ;;  %v666_v45 = vpop.f32.mrb[12].mxu1 }
 0x11b   : > { %871 = vst.msk [vmem:[%s1405_s22 + $0x14] sm:$0xf] %vm865_vm3, %v1111_v42  ;;  %887 = vst.msk [vmem:[%s1405_s22 + $0x54] sm:$0xf] %vm865_vm3, %v1127_v43  ;;  %v603_v46 = vadd.f32 %v1395_v47, %v602_v44  ;;  %v667_v48 = vadd.f32 %v1395_v47, %v666_v45  ;;  %v604_v49 = vpop.f32.mrb[13].mxu0  ;;  %v668_v50 = vpop.f32.mrb[13].mxu1 }
 0x11c   : > { %v605_v51 = vpop.f32.mrb[14].mxu0  ;;  %v669_v52 = vpop.f32.mrb[14].mxu1 }
 0x11d   : > { %v711_v53 = vmax.f32 %v603_v46, 0.0  ;;  %v727_v54 = vmax.f32 %v667_v48, 0.0  ;;  %v606_v55 = vadd.f32 %v1395_v47, %v605_v51  ;;  %v670_v56 = vadd.f32 %v1395_v47, %v669_v52  ;;  %v607_v57 = vpop.f32.mrb[15].mxu0  ;;  %v671_v58 = vpop.f32.mrb[15].mxu1 }
 0x11f   : > { %v1112_v59 = vpack.c.bf16 %v711_v53, %v711_v53  ;;  %v1128_v60 = vpack.c.bf16 %v727_v54, %v727_v54  ;;  %v712_v61 = vmax.f32 %v606_v55, 0.0  ;;  %v728_v62 = vmax.f32 %v670_v56, 0.0 }
 0x121   : > { %872 = vst.msk [vmem:[%s1405_s22 + $0x18] sm:$0xf] %vm865_vm3, %v1112_v59  ;;  %888 = vst.msk [vmem:[%s1405_s22 + $0x58] sm:$0xf] %vm865_vm3, %v1128_v60  ;;  %v1113_v63 = vpack.c.bf16 %v712_v61, %v712_v61  ;;  %v1129_v0 = vpack.c.bf16 %v728_v62, %v728_v62 }
 0x122   : > { %v610_v1 = vpop.f32.mrb[16].mxu0  ;;  %v674_v2 = vpop.f32.mrb[16].mxu1 }
 0x123   : > { %873 = vst.msk [vmem:[%s1405_s22 + $0x1c] sm:$0xf] %vm865_vm3, %v1113_v63  ;;  %889 = vst.msk [vmem:[%s1405_s22 + $0x5c] sm:$0xf] %vm865_vm3, %v1129_v0  ;;  %v611_v3 = vadd.f32 %v1395_v47, %v610_v1  ;;  %v675_v4 = vadd.f32 %v1395_v47, %v674_v2  ;;  %v612_v5 = vpop.f32.mrb[17].mxu0  ;;  %v676_v6 = vpop.f32.mrb[17].mxu1 }
 0x124   : > { %v613_v7 = vpop.f32.mrb[18].mxu0  ;;  %v677_v8 = vpop.f32.mrb[18].mxu1 }
 0x125   : > { %v713_v9 = vmax.f32 %v611_v3, 0.0  ;;  %v729_v10 = vmax.f32 %v675_v4, 0.0  ;;  %v614_v11 = vadd.f32 %v1395_v47, %v613_v7  ;;  %v678_v12 = vadd.f32 %v1395_v47, %v677_v8  ;;  %v615_v13 = vpop.f32.mrb[19].mxu0  ;;  %v679_v14 = vpop.f32.mrb[19].mxu1 }
 0x127   : > { %v1114_v15 = vpack.c.bf16 %v713_v9, %v713_v9  ;;  %v1130_v16 = vpack.c.bf16 %v729_v10, %v729_v10  ;;  %v714_v17 = vmax.f32 %v614_v11, 0.0  ;;  %v730_v18 = vmax.f32 %v678_v12, 0.0 }
 0x129   : > { %874 = vst.msk [vmem:[%s1405_s22 + $0x20] sm:$0xf] %vm865_vm3, %v1114_v15  ;;  %890 = vst.msk [vmem:[%s1405_s22 + $0x60] sm:$0xf] %vm865_vm3, %v1130_v16  ;;  %v1115_v19 = vpack.c.bf16 %v714_v17, %v714_v17  ;;  %v1131_v20 = vpack.c.bf16 %v730_v18, %v730_v18 }
 0x12a   : > { %v618_v21 = vpop.f32.mrb[20].mxu0  ;;  %v682_v22 = vpop.f32.mrb[20].mxu1 }
 0x12b   : > { %875 = vst.msk [vmem:[%s1405_s22 + $0x24] sm:$0xf] %vm865_vm3, %v1115_v19  ;;  %891 = vst.msk [vmem:[%s1405_s22 + $0x64] sm:$0xf] %vm865_vm3, %v1131_v20  ;;  %v619_v23 = vadd.f32 %v1395_v47, %v618_v21  ;;  %v683_v24 = vadd.f32 %v1395_v47, %v682_v22  ;;  %v620_v25 = vpop.f32.mrb[21].mxu0  ;;  %v684_v26 = vpop.f32.mrb[21].mxu1 }
 0x12c   : > { %v621_v27 = vpop.f32.mrb[22].mxu0  ;;  %v685_v28 = vpop.f32.mrb[22].mxu1 }
 0x12d   : > { %v715_v29 = vmax.f32 %v619_v23, 0.0  ;;  %v731_v30 = vmax.f32 %v683_v24, 0.0  ;;  %v622_v31 = vadd.f32 %v1395_v47, %v621_v27  ;;  %v686_v32 = vadd.f32 %v1395_v47, %v685_v28  ;;  %v623_v33 = vpop.f32.mrb[23].mxu0  ;;  %v687_v34 = vpop.f32.mrb[23].mxu1 }
 0x12f   : > { %v1116_v35 = vpack.c.bf16 %v715_v29, %v715_v29  ;;  %v1132_v36 = vpack.c.bf16 %v731_v30, %v731_v30  ;;  %v716_v37 = vmax.f32 %v622_v31, 0.0  ;;  %v732_v38 = vmax.f32 %v686_v32, 0.0 }
 0x131   : > { %876 = vst.msk [vmem:[%s1405_s22 + $0x28] sm:$0xf] %vm865_vm3, %v1116_v35  ;;  %892 = vst.msk [vmem:[%s1405_s22 + $0x68] sm:$0xf] %vm865_vm3, %v1132_v36  ;;  %v1117_v39 = vpack.c.bf16 %v716_v37, %v716_v37  ;;  %v1133_v40 = vpack.c.bf16 %v732_v38, %v732_v38 }
 0x132   : > { %v626_v41 = vpop.f32.mrb[24].mxu0  ;;  %v690_v42 = vpop.f32.mrb[24].mxu1 }
 0x133   : > { %877 = vst.msk [vmem:[%s1405_s22 + $0x2c] sm:$0xf] %vm865_vm3, %v1117_v39  ;;  %893 = vst.msk [vmem:[%s1405_s22 + $0x6c] sm:$0xf] %vm865_vm3, %v1133_v40  ;;  %v627_v43 = vadd.f32 %v1395_v47, %v626_v41  ;;  %v691_v44 = vadd.f32 %v1395_v47, %v690_v42  ;;  %v628_v45 = vpop.f32.mrb[25].mxu0  ;;  %v692_v46 = vpop.f32.mrb[25].mxu1 }
 0x134   : > { %v629_v48 = vpop.f32.mrb[26].mxu0  ;;  %v693_v49 = vpop.f32.mrb[26].mxu1 }
 0x135   : > { %v717_v50 = vmax.f32 %v627_v43, 0.0  ;;  %v733_v51 = vmax.f32 %v691_v44, 0.0  ;;  %v630_v52 = vadd.f32 %v1395_v47, %v629_v48  ;;  %v694_v53 = vadd.f32 %v1395_v47, %v693_v49  ;;  %v631_v54 = vpop.f32.mrb[27].mxu0  ;;  %v695_v55 = vpop.f32.mrb[27].mxu1 }
 0x137   : > { %v1118_v56 = vpack.c.bf16 %v717_v50, %v717_v50  ;;  %v1134_v57 = vpack.c.bf16 %v733_v51, %v733_v51  ;;  %v718_v58 = vmax.f32 %v630_v52, 0.0  ;;  %v734_v59 = vmax.f32 %v694_v53, 0.0 }
 0x139   : > { %878 = vst.msk [vmem:[%s1405_s22 + $0x30] sm:$0xf] %vm865_vm3, %v1118_v56  ;;  %894 = vst.msk [vmem:[%s1405_s22 + $0x70] sm:$0xf] %vm865_vm3, %v1134_v57  ;;  %v1119_v60 = vpack.c.bf16 %v718_v58, %v718_v58  ;;  %v1135_v61 = vpack.c.bf16 %v734_v59, %v734_v59 }
 0x13a   : > { %v634_v62 = vpop.f32.mrb[28].mxu0  ;;  %v698_v63 = vpop.f32.mrb[28].mxu1 }
 0x13b   : > { %879 = vst.msk [vmem:[%s1405_s22 + $0x34] sm:$0xf] %vm865_vm3, %v1119_v60  ;;  %895 = vst.msk [vmem:[%s1405_s22 + $0x74] sm:$0xf] %vm865_vm3, %v1135_v61  ;;  %v635_v0 = vadd.f32 %v1395_v47, %v634_v62  ;;  %v699_v1 = vadd.f32 %v1395_v47, %v698_v63  ;;  %v636_v2 = vpop.f32.mrb[29].mxu0  ;;  %v700_v3 = vpop.f32.mrb[29].mxu1 }
 0x13c   : > { %v637_v4 = vpop.f32.mrb[30].mxu0  ;;  %v701_v5 = vpop.f32.mrb[30].mxu1 }
 0x13d   : > { %v719_v6 = vmax.f32 %v635_v0, 0.0  ;;  %v735_v7 = vmax.f32 %v699_v1, 0.0  ;;  %v638_v8 = vadd.f32 %v1395_v47, %v637_v4  ;;  %v702_v9 = vadd.f32 %v1395_v47, %v701_v5  ;;  %v639_v10 = vpop.f32.mrb[31].mxu0  ;;  %v703_v11 = vpop.f32.mrb[31].mxu1 }
 0x13f   : > { %v1120_v12 = vpack.c.bf16 %v719_v6, %v719_v6  ;;  %v1136_v13 = vpack.c.bf16 %v735_v7, %v735_v7  ;;  %v720_v14 = vmax.f32 %v638_v8, 0.0  ;;  %v736_v15 = vmax.f32 %v702_v9, 0.0 }
 0x141   : > { %880 = vst.msk [vmem:[%s1405_s22 + $0x38] sm:$0xf] %vm865_vm3, %v1120_v12  ;;  %896 = vst.msk [vmem:[%s1405_s22 + $0x78] sm:$0xf] %vm865_vm3, %v1136_v13  ;;  %v1121_v16 = vpack.c.bf16 %v720_v14, %v720_v14  ;;  %v1137_v17 = vpack.c.bf16 %v736_v15, %v736_v15 }
 0x143   : > { %881 = vst.msk [vmem:[%s1405_s22 + $0x3c] sm:$0xf] %vm865_vm3, %v1121_v16  ;;  %897 = vst.msk [vmem:[%s1405_s22 + $0x7c] sm:$0xf] %vm865_vm3, %v1137_v17 }
 0x144 PF: > { %s13_s14 = sadd.s32 1, %s1264_s14   ;;  %s1512_s12 = smov %s1260_s13 }
 0x145   : > { %p10_p5 = scmp.ge.s32.totalorder %s13_s14, 10   ;;  %s1513_s13 = smov %s1515_s15 }
 0x147   :  { %12 = sbr.rel (!%p10_p5) target bundleno = 2 (0x2), region = 68 }

</bundles_post_ra>
